<compile_context>
chip_gen: v6e
topology: v6e:2x2x1
jax: 0.10.0
libtpu: 0.0.40
codegen_flags: <defaults>
</compile_context>

<pallas_src>
import math

import jax
import jax.numpy as jnp
import numpy as np
from jax.experimental import pallas as pl
from jax.experimental.pallas import tpu as pltpu

D_MODEL = 32
N_HEADS = 4
RANK_U = 4
DK = D_MODEL // N_HEADS          # 8
HALF = DK // 2                   # 4
SCALE = 1.0 / math.sqrt(DK)
NEG_INF = -1e30


def _slab_rows(seq_len):
    """Row offsets inside the packed f32 constant slab."""
    r_rot = 0                                   # rows [0, N)      : [CQ|SQ|CK|SK]
    r_scale = seq_len                           # row  N           : [alpha_all | alpha_o]
    r_bias = seq_len + 1                        # row  N+1         : [b_all | 0]
    r_mask = ((seq_len + 2 + 7) // 8) * 8       # rows [r_mask, +hN): [mask | U_blk]
    return r_rot, r_scale, r_bias, r_mask


# ---------------------------------------------------------------------------
# one-time, host-side parameter / table preparation (everything batch-indep.)
# ---------------------------------------------------------------------------
def build_params(w_qkv, b_qkv, U, w_o, seq_len):
    h, dk, half, d, N, r = N_HEADS, DK, HALF, D_MODEL, seq_len, RANK_U
    assert 4 * d <= 128 and h * N <= 128 and d + h * r <= 128

    w_qkv = np.asarray(w_qkv, np.float32)
    w_o = np.asarray(w_o, np.float32)
    b_qkv = np.asarray(b_qkv, np.float32)
    U = np.asarray(U, np.float32)

    def ternary_parts(w):
        th = 0.05 * np.mean(np.abs(w))
        sign = np.where(np.abs(w) < th, 0.0, np.sign(w)).astype(np.float32)
        alpha = np.mean(np.abs(w), axis=1).astype(np.float32)   # per output feature
        return sign, alpha

    sgn_qkv, alpha_qkv = ternary_parts(w_qkv)       # (d,d), (d,)
    sgn_o, alpha_o = ternary_parts(w_o)

    signT = sgn_qkv.T                               # (in=d, out=d); column o scale = alpha[o]

    # column permutations realizing the rotary even/odd selectors per head:
    #   t12 = [t1 | t2] (evens|odds), t21 = [t2 | t1]
    p12 = np.zeros(d, np.int32)
    p21 = np.zeros(d, np.int32)
    for hh in range(h):
        for j in range(dk):
            if j < half:
                p12[hh * dk + j] = hh * dk + 2 * j
                p21[hh * dk + j] = hh * dk + 2 * j + 1
            else:
                p12[hh * dk + j] = hh * dk + 2 * (j - half) + 1
                p21[hh * dk + j] = hh * dk + 2 * (j - half)

    sign_all = np.concatenate([signT, signT[:, p12], signT[:, p21]], axis=1)   # (d, 3d)
    alpha_all = np.concatenate([alpha_qkv, alpha_qkv[p12], alpha_qkv[p21]])    # (3d,)
    b_all = np.concatenate([b_qkv, b_qkv[p12], b_qkv[p21]])                    # (3d,)

    # rotary tables (same arithmetic as the PyTorch rotary())
    inv = 1.0 / (10000.0 ** (np.arange(half, dtype=np.float32) / half))
    ang = np.arange(N, dtype=np.float32)[:, None] * inv            # (N, half)
    c, s = np.cos(ang), np.sin(ang)

    CQ = np.zeros((N, d), np.float32)
    SQ = np.zeros((N, d), np.float32)
    CK = np.zeros((N, d), np.float32)
    SK = np.zeros((N, d), np.float32)
    for n in range(N):
        for w in range(h):
            # q path: column block w == q head, rotary position == row n
            CQ[n, w * dk:(w + 1) * dk] = np.concatenate([c[n], c[n]])
            SQ[n, w * dk:(w + 1) * dk] = np.concatenate([-s[n], s[n]])
            # k/v `.view_as` quirk: proj row n / block w is k & v of head
            # (n*h+w)//N at sequence position m = (n*h+w) % N
            m = (n * h + w) % N
            CK[n, w * dk:(w + 1) * dk] = np.concatenate([c[m], c[m]])
            SK[n, w * dk:(w + 1) * dk] = np.concatenate([-s[m], s[m]])

    # additive block mask for the head-stacked (h*N, h*N) score matrix:
    # stacked q row i has head i//N; stacked k row j has head ((j%N)*h + j//N)//N.
    idx = np.arange(h * N)
    q_head = idx // N
    k_head = ((idx % N) * h + idx // N) // N
    mask = np.where(q_head[:, None] == k_head[None, :], 0.0, NEG_INF).astype(np.float32)

    # block-diagonal U so q@U / k@U stay lane-dense for all heads at once
    u_blk = np.zeros((d, h * r), np.float32)
    for w in range(h):
        u_blk[w * dk:(w + 1) * dk, w * r:(w + 1) * r] = U

    # --- pack everything into two slabs ---
    sign_slab = np.zeros((d, 128), np.float32)
    sign_slab[:, 0:3 * d] = sign_all
    sign_slab[:, 3 * d:4 * d] = sgn_o.T

    r_rot, r_scale, r_bias, r_mask = _slab_rows(N)
    cst = np.zeros((r_mask + h * N, 128), np.float32)
    cst[r_rot:r_rot + N, 0:d] = CQ
    cst[r_rot:r_rot + N, d:2 * d] = SQ
    cst[r_rot:r_rot + N, 2 * d:3 * d] = CK
    cst[r_rot:r_rot + N, 3 * d:4 * d] = SK
    cst[r_scale, 0:3 * d] = alpha_all
    cst[r_scale, 3 * d:4 * d] = alpha_o
    cst[r_bias, 0:3 * d] = b_all
    cst[r_mask:r_mask + h * N, 0:h * N] = mask
    cst[r_mask:r_mask + d, d:d + h * r] = u_blk

    return (jnp.asarray(sign_slab, jnp.bfloat16), jnp.asarray(cst, jnp.float32))


# ---------------------------------------------------------------------------
# fused kernel: one grid step per batch-block, all heads at once
# ---------------------------------------------------------------------------
def _mha_kernel(x_ref, sign_ref, cst_ref, o_ref):
    f32 = jnp.float32
    bb, n, d = x_ref.shape
    h, dk, rk = N_HEADS, DK, RANK_U
    r_rot, r_scale, r_bias, r_mask = _slab_rows(n)

    # ---- unpack constant slabs (static slices) ------------------------------
    sign_all = sign_ref[:, 0:3 * d]                       # (d, 3d)  bf16
    sign_o = sign_ref[:, 3 * d:4 * d]                     # (d, d)   bf16
    rot = cst_ref[r_rot:r_rot + n, :]                     # (N, 4d) = [CQ|SQ|CK|SK]
    alpha_all = cst_ref[r_scale:r_scale + 1, 0:3 * d]     # (1, 3d)
    alpha_o = cst_ref[r_scale:r_scale + 1, 3 * d:4 * d]   # (1, d)
    b_all = cst_ref[r_bias:r_bias + 1, 0:3 * d]           # (1, 3d)
    mask = cst_ref[r_mask:r_mask + h * n, 0:h * n]        # (h*N, h*N)
    u_blk = cst_ref[r_mask:r_mask + d, d:d + h * rk]      # (d, h*r)

    # ---- gather block rows lane-dense: (bb*N, d) ----------------------------
    if bb == 1:
        x = x_ref[0]
        rot_f = rot
    else:
        x = jnp.concatenate([x_ref[b] for b in range(bb)], axis=0)
        rot_f = jnp.concatenate([rot] * bb, axis=0)
    cq = rot_f[:, 0:d]
    sq = rot_f[:, d:2 * d]
    ck = rot_f[:, 2 * d:3 * d]
    sk = rot_f[:, 3 * d:4 * d]

    # ---- BitLinear qkv with the rotary selectors folded into the weight -----
    # exact bf16 matmul (integer levels x ternary signs); scales applied after.
    ma_x = jnp.maximum(jnp.max(jnp.abs(x), axis=-1, keepdims=True), 1e-6)
    qlev = jnp.clip(jnp.round(x / ma_x * 7.0), -8.0, 7.0)
    acc = jnp.dot(qlev.astype(jnp.bfloat16), sign_all, preferred_element_type=f32)
    pall = acc * (ma_x * (1.0 / 7.0)) * alpha_all + b_all          # (bb*N, 3d)
    proj = pall[:, 0:d]          # == v (and pre-rotary q/k), lane-dense
    t12 = pall[:, d:2 * d]       # per-head [even | odd] lanes
    t21 = pall[:, 2 * d:3 * d]   # per-head [odd | even] lanes

    # ---- rotary, lane-dense, even/odd products shared by q and k ------------
    q_rot = t12 * cq + t21 * sq
    k_rot = t12 * ck + t21 * sk

    # ---- low-rank projection for every head at once (block-diagonal U) ------
    ql = jnp.dot(q_rot, u_blk, preferred_element_type=f32)        # (bb*N, h*r)
    kl = jnp.dot(k_rot, u_blk, preferred_element_type=f32)        # (bb*N, h*r)

    # ---- attention core per batch, in head-stacked layout -------------------
    def stack(a, w):    # (N, h*w) -> (h*N, w)
        return jnp.concatenate([a[:, i * w:(i + 1) * w] for i in range(h)], axis=0)

    def unstack(a, w):  # (h*N, w) -> (N, h*w)
        return jnp.concatenate([a[i * n:(i + 1) * n, :] for i in range(h)], axis=1)

    y_parts = []
    for b in range(bb):
        rows = slice(b * n, (b + 1) * n)
        qs = stack(ql[rows], rk)                                   # (h*N, r)
        ks = stack(kl[rows], rk)                                   # (h*N, r)
        vs = stack(proj[rows], dk)                                 # (h*N, dk)
        s = jax.lax.dot_general(qs, ks, (((1,), (1,)), ((), ())),
                                preferred_element_type=f32) * SCALE
        s = s + mask           # cross-head blocks -> exp() underflows to exactly 0
        # TODO(synk): optional additive attention mask argument (mask=None path implemented)
        mx = jnp.max(s, axis=-1, keepdims=True)
        e = jnp.exp(s - mx)
        p = e / jnp.sum(e, axis=-1, keepdims=True)
        y_parts.append(unstack(jnp.dot(p, vs, preferred_element_type=f32), dk))
    y = y_parts[0] if bb == 1 else jnp.concatenate(y_parts, axis=0)   # (bb*N, d)

    # ---- BitLinear out (no bias), same exact integer/bf16 factorization -----
    ma_y = jnp.maximum(jnp.max(jnp.abs(y), axis=-1, keepdims=True), 1e-6)
    ylev = jnp.clip(jnp.round(y / ma_y * 7.0), -8.0, 7.0)
    out = jnp.dot(ylev.astype(jnp.bfloat16), sign_o,
                  preferred_element_type=f32) * (ma_y * (1.0 / 7.0)) * alpha_o

    for b in range(bb):
        o_ref[b] = out[b * n:(b + 1) * n, :]


def _default_batch_block(B):
    # v7x has two TensorCores per chip -> keep two parallel grid steps; the
    # single-core v5e/v6e chips fold the whole batch into one grid step.
    try:
        kind = jax.devices()[0].device_kind.lower()
    except Exception:
        kind = ""
    bb = max(1, B // 2) if ("v7" in kind or "7x" in kind) else B
    while B % bb:
        bb -= 1
    return bb


def low_rank_mha(x, params, *, batch_block=None):
    sign_slab, cst = params
    B, N, d = x.shape
    bb = _default_batch_block(B) if batch_block is None else batch_block
    bb = max(1, min(bb, B))
    while B % bb:
        bb -= 1

    return pl.pallas_call(
        _mha_kernel,
        out_shape=jax.ShapeDtypeStruct((B, N, d), jnp.float32),
        grid=(B // bb,),
        in_specs=[
            pl.BlockSpec((bb, N, d), lambda i: (i, 0, 0)),
            pl.BlockSpec(sign_slab.shape, lambda i: (0, 0)),
            pl.BlockSpec(cst.shape, lambda i: (0, 0)),
        ],
        out_specs=pl.BlockSpec((bb, N, d), lambda i: (i, 0, 0)),
        compiler_params=pltpu.CompilerParams(
            dimension_semantics=("parallel",)),
    )(x, sign_slab, cst)


# ---------------------------------------------------------------------------
# Pure-JAX reference (mirrors the PyTorch forward exactly)
# ---------------------------------------------------------------------------
def _ref_forward(x, w_qkv, b_qkv, U, w_o):
    hi = jax.lax.Precision.HIGHEST

    def quant4(t):
        ma = jnp.maximum(jnp.max(jnp.abs(t), -1, keepdims=True), 1e-6)
        q = jnp.clip(jnp.round(t / ma * 7.0), -8.0, 7.0)
        return q * ma / 7.0

    def ternary(w):
        th = 0.05 * jnp.mean(jnp.abs(w))
        sign = jnp.where(jnp.abs(w) < th, 0.0, jnp.sign(w))
        return sign * jnp.mean(jnp.abs(w), axis=1, keepdims=True)

    def lin(t, w, b):
        y = jnp.einsum('...i,oi->...o', quant4(t), ternary(w), precision=hi)
        return y if b is None else y + b

    def rotary(t, n):
        half = t.shape[-1] // 2
        inv = 1.0 / (10000.0 ** (jnp.arange(half, dtype=jnp.float32) / half))
        ang = jnp.arange(n, dtype=jnp.float32)[:, None] * inv
        c, s = jnp.cos(ang), jnp.sin(ang)
        t1, t2 = t[..., ::2], t[..., 1::2]
        return jnp.concatenate([t1 * c - t2 * s, t1 * s + t2 * c], -1)

    B, N, d = x.shape
    proj = lin(x, w_qkv, b_qkv)
    q = proj.reshape(B, N, N_HEADS, DK).transpose(0, 2, 1, 3)
    k = proj.reshape(B, N_HEADS, N, DK)
    v = proj.reshape(B, N_HEADS, N, DK)
    q, k = rotary(q, N), rotary(k, N)
    q = jnp.einsum('bhnd,dr->bhnr', q, U, precision=hi)
    k = jnp.einsum('bhnd,dr->bhnr', k, U, precision=hi)
    att = jnp.einsum('bhnr,bhmr->bhnm', q, k, precision=hi) / math.sqrt(DK)
    p = jax.nn.softmax(att, -1)
    y = jnp.einsum('bhnm,bhmd->bhnd', p, v, precision=hi)
    y = y.transpose(0, 2, 1, 3).reshape(B, N, d)
    return lin(y, w_o, None)


if __name__ == "__main__":
    B, N = 2, 8
    key = jax.random.PRNGKey(0)
    k1, k2, k3, kx = jax.random.split(key, 4)

    # Deterministic synthetic parameters (shapes from LowRankMHA.__init__)
    w_qkv = jax.random.normal(k1, (D_MODEL, D_MODEL), jnp.float32) / math.sqrt(D_MODEL)
    b_qkv = jnp.zeros((D_MODEL,), jnp.float32)
    U, _ = jnp.linalg.qr(jax.random.normal(k2, (DK, RANK_U), jnp.float32))
    U = U.astype(jnp.float32)
    w_o = jax.random.normal(k3, (D_MODEL, D_MODEL), jnp.float32) / math.sqrt(D_MODEL)

    x = jax.random.normal(kx, (B, N, D_MODEL), jnp.float32)

    params = build_params(w_qkv, b_qkv, U, w_o, N)
    out = jax.jit(low_rank_mha)(x, params)
    out = jax.block_until_ready(out)

    ref = _ref_forward(x, w_qkv, b_qkv, U, w_o)
    np.testing.assert_allclose(np.asarray(out), np.asarray(ref), rtol=5e-2, atol=5e-2)

    print("KERNEL_OK")
</pallas_src>

<mosaic_0001>
module attributes {stable_mosaic.version = 11 : i64} {
  func.func @_mha_kernel(%arg0: i32, %arg1: memref<2x8x32xf32, #tpu.memory_space<vmem>>, %arg2: memref<32x128xbf16, #tpu.memory_space<vmem>>, %arg3: memref<48x128xf32, #tpu.memory_space<vmem>>, %arg4: memref<2x8x32xf32, #tpu.memory_space<vmem>>) attributes {dimension_semantics = [#tpu.dimension_semantics<parallel>], iteration_bounds = array<i64: 1>, scalar_prefetch = 0 : i64, scratch_operands = 0 : i64, tpu.core_type = #tpu.core_type<tc>, window_params = [{transform_indices = @transform_0, window_bounds = array<i64: 2, 8, 32>}, {pipeline_mode = #tpu.pipeline_mode<synchronous>, transform_indices = @transform_1, window_bounds = array<i64: 32, 128>}, {pipeline_mode = #tpu.pipeline_mode<synchronous>, transform_indices = @transform_2, window_bounds = array<i64: 48, 128>}, {transform_indices = @transform_3, window_bounds = array<i64: 2, 8, 32>}]} {
    %c0 = arith.constant 0 : index
    %c0_0 = arith.constant 0 : index
    %0 = vector.load %arg2[%c0, %c0_0] : memref<32x128xbf16, #tpu.memory_space<vmem>>, vector<32x96xbf16>
    %c0_1 = arith.constant 0 : index
    %c96 = arith.constant 96 : index
    %1 = vector.load %arg2[%c0_1, %c96] : memref<32x128xbf16, #tpu.memory_space<vmem>>, vector<32x32xbf16>
    %c0_2 = arith.constant 0 : index
    %c0_3 = arith.constant 0 : index
    %2 = vector.load %arg3[%c0_2, %c0_3] : memref<48x128xf32, #tpu.memory_space<vmem>>, vector<8x128xf32>
    %c8 = arith.constant 8 : index
    %c0_4 = arith.constant 0 : index
    %3 = vector.load %arg3[%c8, %c0_4] : memref<48x128xf32, #tpu.memory_space<vmem>>, vector<1x96xf32>
    %c8_5 = arith.constant 8 : index
    %c96_6 = arith.constant 96 : index
    %4 = vector.load %arg3[%c8_5, %c96_6] : memref<48x128xf32, #tpu.memory_space<vmem>>, vector<1x32xf32>
    %c9 = arith.constant 9 : index
    %c0_7 = arith.constant 0 : index
    %5 = vector.load %arg3[%c9, %c0_7] : memref<48x128xf32, #tpu.memory_space<vmem>>, vector<1x96xf32>
    %c16 = arith.constant 16 : index
    %c0_8 = arith.constant 0 : index
    %6 = vector.load %arg3[%c16, %c0_8] : memref<48x128xf32, #tpu.memory_space<vmem>>, vector<32x32xf32>
    %c16_9 = arith.constant 16 : index
    %c32 = arith.constant 32 : index
    %7 = vector.load %arg3[%c16_9, %c32] : memref<48x128xf32, #tpu.memory_space<vmem>>, vector<32x16xf32>
    %c0_10 = arith.constant 0 : index
    %c0_11 = arith.constant 0 : index
    %c0_12 = arith.constant 0 : index
    %8 = vector.load %arg1[%c0_10, %c0_11, %c0_12] : memref<2x8x32xf32, #tpu.memory_space<vmem>>, vector<1x8x32xf32>
    %9 = vector.shape_cast %8 : vector<1x8x32xf32> to vector<8x32xf32>
    %c1 = arith.constant 1 : index
    %c0_13 = arith.constant 0 : index
    %c0_14 = arith.constant 0 : index
    %10 = vector.load %arg1[%c1, %c0_13, %c0_14] : memref<2x8x32xf32, #tpu.memory_space<vmem>>, vector<1x8x32xf32>
    %11 = vector.shape_cast %10 : vector<1x8x32xf32> to vector<8x32xf32>
    %12 = tpu.concatenate %9, %11 in 0 : vector<8x32xf32>, vector<8x32xf32> -> vector<16x32xf32>
    %13 = tpu.concatenate %2, %2 in 0 : vector<8x128xf32>, vector<8x128xf32> -> vector<16x128xf32>
    %14 = vector.extract_strided_slice %13 {offsets = [0, 0], sizes = [16, 32], strides = [1, 1]} : vector<16x128xf32> to vector<16x32xf32>
    %15 = vector.extract_strided_slice %13 {offsets = [0, 32], sizes = [16, 32], strides = [1, 1]} : vector<16x128xf32> to vector<16x32xf32>
    %16 = vector.extract_strided_slice %13 {offsets = [0, 64], sizes = [16, 32], strides = [1, 1]} : vector<16x128xf32> to vector<16x32xf32>
    %17 = vector.extract_strided_slice %13 {offsets = [0, 96], sizes = [16, 32], strides = [1, 1]} : vector<16x128xf32> to vector<16x32xf32>
    %18 = math.absf %12 : vector<16x32xf32>
    %cst = arith.constant dense<0xFF800000> : vector<16xf32>
    %19 = vector.multi_reduction <maximumf>, %18, %cst [1] : vector<16x32xf32> to vector<16xf32>
    %20 = vector.shape_cast %19 : vector<16xf32> to vector<16x1xf32>
    %cst_15 = arith.constant 9.99999997E-7 : f32
    %21 = vector.broadcast %cst_15 : f32 to vector<16x1xf32>
    %22 = arith.maximumf %20, %21 : vector<16x1xf32>
    %23 = vector.broadcast %22 : vector<16x1xf32> to vector<16x32xf32>
    %24 = arith.divf %12, %23 : vector<16x32xf32>
    %cst_16 = arith.constant 7.000000e+00 : f32
    %25 = vector.broadcast %cst_16 : f32 to vector<16x32xf32>
    %26 = arith.mulf %24, %25 : vector<16x32xf32>
    %27 = math.roundeven %26 : vector<16x32xf32>
    %cst_17 = arith.constant -8.000000e+00 : f32
    %cst_18 = arith.constant 7.000000e+00 : f32
    %28 = vector.broadcast %cst_17 : f32 to vector<16x32xf32>
    %29 = arith.maximumf %28, %27 : vector<16x32xf32>
    %30 = vector.broadcast %cst_18 : f32 to vector<16x32xf32>
    %31 = arith.minimumf %30, %29 : vector<16x32xf32>
    %32 = arith.truncf %31 : vector<16x32xf32> to vector<16x32xbf16>
    %cst_19 = arith.constant dense<0.000000e+00> : vector<16x96xf32>
    %33 = tpu.matmul %32, %0, %cst_19 {dimension_numbers = #tpu.dot_dimension_numbers<[1], [0], [0], [1], [0, 0, 1, 1], [], []>} : vector<16x32xbf16>, vector<32x96xbf16>, vector<16x96xf32> -> vector<16x96xf32>
    %cst_20 = arith.constant 0.142857149 : f32
    %34 = vector.broadcast %cst_20 : f32 to vector<16x1xf32>
    %35 = arith.mulf %22, %34 : vector<16x1xf32>
    %36 = vector.broadcast %35 : vector<16x1xf32> to vector<16x96xf32>
    %37 = arith.mulf %33, %36 : vector<16x96xf32>
    %38 = vector.broadcast %3 : vector<1x96xf32> to vector<16x96xf32>
    %39 = arith.mulf %37, %38 : vector<16x96xf32>
    %40 = vector.broadcast %5 : vector<1x96xf32> to vector<16x96xf32>
    %41 = arith.addf %39, %40 : vector<16x96xf32>
    %42 = vector.extract_strided_slice %41 {offsets = [0, 0], sizes = [16, 32], strides = [1, 1]} : vector<16x96xf32> to vector<16x32xf32>
    %43 = vector.extract_strided_slice %41 {offsets = [0, 32], sizes = [16, 32], strides = [1, 1]} : vector<16x96xf32> to vector<16x32xf32>
    %44 = vector.extract_strided_slice %41 {offsets = [0, 64], sizes = [16, 32], strides = [1, 1]} : vector<16x96xf32> to vector<16x32xf32>
    %45 = arith.mulf %43, %14 : vector<16x32xf32>
    %46 = arith.mulf %44, %15 : vector<16x32xf32>
    %47 = arith.addf %45, %46 : vector<16x32xf32>
    %48 = arith.mulf %43, %16 : vector<16x32xf32>
    %49 = arith.mulf %44, %17 : vector<16x32xf32>
    %50 = arith.addf %48, %49 : vector<16x32xf32>
    %cst_21 = arith.constant dense<0.000000e+00> : vector<16x16xf32>
    %51 = tpu.matmul %47, %7, %cst_21 {dimension_numbers = #tpu.dot_dimension_numbers<[1], [0], [0], [1], [0, 0, 1, 1], [], []>} : vector<16x32xf32>, vector<32x16xf32>, vector<16x16xf32> -> vector<16x16xf32>
    %cst_22 = arith.constant dense<0.000000e+00> : vector<16x16xf32>
    %52 = tpu.matmul %50, %7, %cst_22 {dimension_numbers = #tpu.dot_dimension_numbers<[1], [0], [0], [1], [0, 0, 1, 1], [], []>} : vector<16x32xf32>, vector<32x16xf32>, vector<16x16xf32> -> vector<16x16xf32>
    %53 = vector.extract_strided_slice %51 {offsets = [0, 0], sizes = [8, 16], strides = [1, 1]} : vector<16x16xf32> to vector<8x16xf32>
    %54 = vector.extract_strided_slice %53 {offsets = [0, 0], sizes = [8, 4], strides = [1, 1]} : vector<8x16xf32> to vector<8x4xf32>
    %55 = vector.extract_strided_slice %53 {offsets = [0, 4], sizes = [8, 4], strides = [1, 1]} : vector<8x16xf32> to vector<8x4xf32>
    %56 = vector.extract_strided_slice %53 {offsets = [0, 8], sizes = [8, 4], strides = [1, 1]} : vector<8x16xf32> to vector<8x4xf32>
    %57 = vector.extract_strided_slice %53 {offsets = [0, 12], sizes = [8, 4], strides = [1, 1]} : vector<8x16xf32> to vector<8x4xf32>
    %58 = tpu.concatenate %54, %55, %56, %57 in 0 : vector<8x4xf32>, vector<8x4xf32>, vector<8x4xf32>, vector<8x4xf32> -> vector<32x4xf32>
    %59 = vector.extract_strided_slice %52 {offsets = [0, 0], sizes = [8, 16], strides = [1, 1]} : vector<16x16xf32> to vector<8x16xf32>
    %60 = vector.extract_strided_slice %59 {offsets = [0, 0], sizes = [8, 4], strides = [1, 1]} : vector<8x16xf32> to vector<8x4xf32>
    %61 = vector.extract_strided_slice %59 {offsets = [0, 4], sizes = [8, 4], strides = [1, 1]} : vector<8x16xf32> to vector<8x4xf32>
    %62 = vector.extract_strided_slice %59 {offsets = [0, 8], sizes = [8, 4], strides = [1, 1]} : vector<8x16xf32> to vector<8x4xf32>
    %63 = vector.extract_strided_slice %59 {offsets = [0, 12], sizes = [8, 4], strides = [1, 1]} : vector<8x16xf32> to vector<8x4xf32>
    %64 = tpu.concatenate %60, %61, %62, %63 in 0 : vector<8x4xf32>, vector<8x4xf32>, vector<8x4xf32>, vector<8x4xf32> -> vector<32x4xf32>
    %65 = vector.extract_strided_slice %42 {offsets = [0, 0], sizes = [8, 32], strides = [1, 1]} : vector<16x32xf32> to vector<8x32xf32>
    %66 = vector.extract_strided_slice %65 {offsets = [0, 0], sizes = [8, 8], strides = [1, 1]} : vector<8x32xf32> to vector<8x8xf32>
    %67 = vector.extract_strided_slice %65 {offsets = [0, 8], sizes = [8, 8], strides = [1, 1]} : vector<8x32xf32> to vector<8x8xf32>
    %68 = vector.extract_strided_slice %65 {offsets = [0, 16], sizes = [8, 8], strides = [1, 1]} : vector<8x32xf32> to vector<8x8xf32>
    %69 = vector.extract_strided_slice %65 {offsets = [0, 24], sizes = [8, 8], strides = [1, 1]} : vector<8x32xf32> to vector<8x8xf32>
    %70 = tpu.concatenate %66, %67, %68, %69 in 0 : vector<8x8xf32>, vector<8x8xf32>, vector<8x8xf32>, vector<8x8xf32> -> vector<32x8xf32>
    %cst_23 = arith.constant dense<0.000000e+00> : vector<32x32xf32>
    %71 = tpu.matmul %58, %64, %cst_23 {dimension_numbers = #tpu.dot_dimension_numbers<[1], [1], [0], [0], [0, 0, 1, 0], [], []>} : vector<32x4xf32>, vector<32x4xf32>, vector<32x32xf32> -> vector<32x32xf32>
    %cst_24 = arith.constant 0.353553385 : f32
    %72 = vector.broadcast %cst_24 : f32 to vector<32x32xf32>
    %73 = arith.mulf %71, %72 : vector<32x32xf32>
    %74 = arith.addf %73, %6 : vector<32x32xf32>
    %cst_25 = arith.constant dense<0xFF800000> : vector<32xf32>
    %75 = vector.multi_reduction <maximumf>, %74, %cst_25 [1] : vector<32x32xf32> to vector<32xf32>
    %76 = vector.shape_cast %75 : vector<32xf32> to vector<32x1xf32>
    %77 = vector.broadcast %76 : vector<32x1xf32> to vector<32x32xf32>
    %78 = arith.subf %74, %77 : vector<32x32xf32>
    %79 = math.exp %78 : vector<32x32xf32>
    %cst_26 = arith.constant dense<0.000000e+00> : vector<32xf32>
    %80 = vector.multi_reduction <add>, %79, %cst_26 [1] : vector<32x32xf32> to vector<32xf32>
    %81 = vector.shape_cast %80 : vector<32xf32> to vector<32x1xf32>
    %82 = vector.broadcast %81 : vector<32x1xf32> to vector<32x32xf32>
    %83 = arith.divf %79, %82 : vector<32x32xf32>
    %cst_27 = arith.constant dense<0.000000e+00> : vector<32x8xf32>
    %84 = tpu.matmul %83, %70, %cst_27 {dimension_numbers = #tpu.dot_dimension_numbers<[1], [0], [0], [1], [0, 0, 1, 1], [], []>} : vector<32x32xf32>, vector<32x8xf32>, vector<32x8xf32> -> vector<32x8xf32>
    %85 = vector.extract_strided_slice %84 {offsets = [0, 0], sizes = [8, 8], strides = [1, 1]} : vector<32x8xf32> to vector<8x8xf32>
    %86 = vector.extract_strided_slice %84 {offsets = [8, 0], sizes = [8, 8], strides = [1, 1]} : vector<32x8xf32> to vector<8x8xf32>
    %87 = vector.extract_strided_slice %84 {offsets = [16, 0], sizes = [8, 8], strides = [1, 1]} : vector<32x8xf32> to vector<8x8xf32>
    %88 = vector.extract_strided_slice %84 {offsets = [24, 0], sizes = [8, 8], strides = [1, 1]} : vector<32x8xf32> to vector<8x8xf32>
    %89 = tpu.concatenate %85, %86, %87, %88 in 1 : vector<8x8xf32>, vector<8x8xf32>, vector<8x8xf32>, vector<8x8xf32> -> vector<8x32xf32>
    %90 = vector.extract_strided_slice %51 {offsets = [8, 0], sizes = [8, 16], strides = [1, 1]} : vector<16x16xf32> to vector<8x16xf32>
    %91 = vector.extract_strided_slice %90 {offsets = [0, 0], sizes = [8, 4], strides = [1, 1]} : vector<8x16xf32> to vector<8x4xf32>
    %92 = vector.extract_strided_slice %90 {offsets = [0, 4], sizes = [8, 4], strides = [1, 1]} : vector<8x16xf32> to vector<8x4xf32>
    %93 = vector.extract_strided_slice %90 {offsets = [0, 8], sizes = [8, 4], strides = [1, 1]} : vector<8x16xf32> to vector<8x4xf32>
    %94 = vector.extract_strided_slice %90 {offsets = [0, 12], sizes = [8, 4], strides = [1, 1]} : vector<8x16xf32> to vector<8x4xf32>
    %95 = tpu.concatenate %91, %92, %93, %94 in 0 : vector<8x4xf32>, vector<8x4xf32>, vector<8x4xf32>, vector<8x4xf32> -> vector<32x4xf32>
    %96 = vector.extract_strided_slice %52 {offsets = [8, 0], sizes = [8, 16], strides = [1, 1]} : vector<16x16xf32> to vector<8x16xf32>
    %97 = vector.extract_strided_slice %96 {offsets = [0, 0], sizes = [8, 4], strides = [1, 1]} : vector<8x16xf32> to vector<8x4xf32>
    %98 = vector.extract_strided_slice %96 {offsets = [0, 4], sizes = [8, 4], strides = [1, 1]} : vector<8x16xf32> to vector<8x4xf32>
    %99 = vector.extract_strided_slice %96 {offsets = [0, 8], sizes = [8, 4], strides = [1, 1]} : vector<8x16xf32> to vector<8x4xf32>
    %100 = vector.extract_strided_slice %96 {offsets = [0, 12], sizes = [8, 4], strides = [1, 1]} : vector<8x16xf32> to vector<8x4xf32>
    %101 = tpu.concatenate %97, %98, %99, %100 in 0 : vector<8x4xf32>, vector<8x4xf32>, vector<8x4xf32>, vector<8x4xf32> -> vector<32x4xf32>
    %102 = vector.extract_strided_slice %42 {offsets = [8, 0], sizes = [8, 32], strides = [1, 1]} : vector<16x32xf32> to vector<8x32xf32>
    %103 = vector.extract_strided_slice %102 {offsets = [0, 0], sizes = [8, 8], strides = [1, 1]} : vector<8x32xf32> to vector<8x8xf32>
    %104 = vector.extract_strided_slice %102 {offsets = [0, 8], sizes = [8, 8], strides = [1, 1]} : vector<8x32xf32> to vector<8x8xf32>
    %105 = vector.extract_strided_slice %102 {offsets = [0, 16], sizes = [8, 8], strides = [1, 1]} : vector<8x32xf32> to vector<8x8xf32>
    %106 = vector.extract_strided_slice %102 {offsets = [0, 24], sizes = [8, 8], strides = [1, 1]} : vector<8x32xf32> to vector<8x8xf32>
    %107 = tpu.concatenate %103, %104, %105, %106 in 0 : vector<8x8xf32>, vector<8x8xf32>, vector<8x8xf32>, vector<8x8xf32> -> vector<32x8xf32>
    %cst_28 = arith.constant dense<0.000000e+00> : vector<32x32xf32>
    %108 = tpu.matmul %95, %101, %cst_28 {dimension_numbers = #tpu.dot_dimension_numbers<[1], [1], [0], [0], [0, 0, 1, 0], [], []>} : vector<32x4xf32>, vector<32x4xf32>, vector<32x32xf32> -> vector<32x32xf32>
    %cst_29 = arith.constant 0.353553385 : f32
    %109 = vector.broadcast %cst_29 : f32 to vector<32x32xf32>
    %110 = arith.mulf %108, %109 : vector<32x32xf32>
    %111 = arith.addf %110, %6 : vector<32x32xf32>
    %cst_30 = arith.constant dense<0xFF800000> : vector<32xf32>
    %112 = vector.multi_reduction <maximumf>, %111, %cst_30 [1] : vector<32x32xf32> to vector<32xf32>
    %113 = vector.shape_cast %112 : vector<32xf32> to vector<32x1xf32>
    %114 = vector.broadcast %113 : vector<32x1xf32> to vector<32x32xf32>
    %115 = arith.subf %111, %114 : vector<32x32xf32>
    %116 = math.exp %115 : vector<32x32xf32>
    %cst_31 = arith.constant dense<0.000000e+00> : vector<32xf32>
    %117 = vector.multi_reduction <add>, %116, %cst_31 [1] : vector<32x32xf32> to vector<32xf32>
    %118 = vector.shape_cast %117 : vector<32xf32> to vector<32x1xf32>
    %119 = vector.broadcast %118 : vector<32x1xf32> to vector<32x32xf32>
    %120 = arith.divf %116, %119 : vector<32x32xf32>
    %cst_32 = arith.constant dense<0.000000e+00> : vector<32x8xf32>
    %121 = tpu.matmul %120, %107, %cst_32 {dimension_numbers = #tpu.dot_dimension_numbers<[1], [0], [0], [1], [0, 0, 1, 1], [], []>} : vector<32x32xf32>, vector<32x8xf32>, vector<32x8xf32> -> vector<32x8xf32>
    %122 = vector.extract_strided_slice %121 {offsets = [0, 0], sizes = [8, 8], strides = [1, 1]} : vector<32x8xf32> to vector<8x8xf32>
    %123 = vector.extract_strided_slice %121 {offsets = [8, 0], sizes = [8, 8], strides = [1, 1]} : vector<32x8xf32> to vector<8x8xf32>
    %124 = vector.extract_strided_slice %121 {offsets = [16, 0], sizes = [8, 8], strides = [1, 1]} : vector<32x8xf32> to vector<8x8xf32>
    %125 = vector.extract_strided_slice %121 {offsets = [24, 0], sizes = [8, 8], strides = [1, 1]} : vector<32x8xf32> to vector<8x8xf32>
    %126 = tpu.concatenate %122, %123, %124, %125 in 1 : vector<8x8xf32>, vector<8x8xf32>, vector<8x8xf32>, vector<8x8xf32> -> vector<8x32xf32>
    %127 = tpu.concatenate %89, %126 in 0 : vector<8x32xf32>, vector<8x32xf32> -> vector<16x32xf32>
    %128 = math.absf %127 : vector<16x32xf32>
    %cst_33 = arith.constant dense<0xFF800000> : vector<16xf32>
    %129 = vector.multi_reduction <maximumf>, %128, %cst_33 [1] : vector<16x32xf32> to vector<16xf32>
    %130 = vector.shape_cast %129 : vector<16xf32> to vector<16x1xf32>
    %cst_34 = arith.constant 9.99999997E-7 : f32
    %131 = vector.broadcast %cst_34 : f32 to vector<16x1xf32>
    %132 = arith.maximumf %130, %131 : vector<16x1xf32>
    %133 = vector.broadcast %132 : vector<16x1xf32> to vector<16x32xf32>
    %134 = arith.divf %127, %133 : vector<16x32xf32>
    %cst_35 = arith.constant 7.000000e+00 : f32
    %135 = vector.broadcast %cst_35 : f32 to vector<16x32xf32>
    %136 = arith.mulf %134, %135 : vector<16x32xf32>
    %137 = math.roundeven %136 : vector<16x32xf32>
    %cst_36 = arith.constant -8.000000e+00 : f32
    %cst_37 = arith.constant 7.000000e+00 : f32
    %138 = vector.broadcast %cst_36 : f32 to vector<16x32xf32>
    %139 = arith.maximumf %138, %137 : vector<16x32xf32>
    %140 = vector.broadcast %cst_37 : f32 to vector<16x32xf32>
    %141 = arith.minimumf %140, %139 : vector<16x32xf32>
    %142 = arith.truncf %141 : vector<16x32xf32> to vector<16x32xbf16>
    %cst_38 = arith.constant dense<0.000000e+00> : vector<16x32xf32>
    %143 = tpu.matmul %142, %1, %cst_38 {dimension_numbers = #tpu.dot_dimension_numbers<[1], [0], [0], [1], [0, 0, 1, 1], [], []>} : vector<16x32xbf16>, vector<32x32xbf16>, vector<16x32xf32> -> vector<16x32xf32>
    %cst_39 = arith.constant 0.142857149 : f32
    %144 = vector.broadcast %cst_39 : f32 to vector<16x1xf32>
    %145 = arith.mulf %132, %144 : vector<16x1xf32>
    %146 = vector.broadcast %145 : vector<16x1xf32> to vector<16x32xf32>
    %147 = arith.mulf %143, %146 : vector<16x32xf32>
    %148 = vector.broadcast %4 : vector<1x32xf32> to vector<16x32xf32>
    %149 = arith.mulf %147, %148 : vector<16x32xf32>
    %150 = vector.extract_strided_slice %149 {offsets = [0, 0], sizes = [8, 32], strides = [1, 1]} : vector<16x32xf32> to vector<8x32xf32>
    %c0_40 = arith.constant 0 : index
    %c0_41 = arith.constant 0 : index
    %c0_42 = arith.constant 0 : index
    %151 = vector.load %arg4[%c0_40, %c0_41, %c0_42] : memref<2x8x32xf32, #tpu.memory_space<vmem>>, vector<1x8x32xf32>
    %152 = vector.shape_cast %151 : vector<1x8x32xf32> to vector<8x32xf32>
    %153 = vector.shape_cast %150 : vector<8x32xf32> to vector<1x8x32xf32>
    tpu.vector_store %arg4[%c0_40, %c0_41, %c0_42], %153 {strides = array<i32>} : memref<2x8x32xf32, #tpu.memory_space<vmem>>, vector<1x8x32xf32>,
    %154 = vector.extract_strided_slice %149 {offsets = [8, 0], sizes = [8, 32], strides = [1, 1]} : vector<16x32xf32> to vector<8x32xf32>
    %c1_43 = arith.constant 1 : index
    %c0_44 = arith.constant 0 : index
    %c0_45 = arith.constant 0 : index
    %155 = vector.load %arg4[%c1_43, %c0_44, %c0_45] : memref<2x8x32xf32, #tpu.memory_space<vmem>>, vector<1x8x32xf32>
    %156 = vector.shape_cast %155 : vector<1x8x32xf32> to vector<8x32xf32>
    %157 = vector.shape_cast %154 : vector<8x32xf32> to vector<1x8x32xf32>
    tpu.vector_store %arg4[%c1_43, %c0_44, %c0_45], %157 {strides = array<i32>} : memref<2x8x32xf32, #tpu.memory_space<vmem>>, vector<1x8x32xf32>,
    return
  }
  func.func @transform_0(%arg0: i32) -> (i32, i32, i32) {
    %c0_i32 = arith.constant 0 : i32
    %c0_i32_0 = arith.constant 0 : i32
    %c0_i32_1 = arith.constant 0 : i32
    return %arg0, %c0_i32, %c0_i32_0 : i32, i32, i32
  }
  func.func @transform_1(%arg0: i32) -> (i32, i32) {
    %c0_i32 = arith.constant 0 : i32
    %c0_i32_0 = arith.constant 0 : i32
    %c0_i32_1 = arith.constant 0 : i32
    return %c0_i32, %c0_i32_0 : i32, i32
  }
  func.func @transform_2(%arg0: i32) -> (i32, i32) {
    %c0_i32 = arith.constant 0 : i32
    %c0_i32_0 = arith.constant 0 : i32
    %c0_i32_1 = arith.constant 0 : i32
    return %c0_i32, %c0_i32_0 : i32, i32
  }
  func.func @transform_3(%arg0: i32) -> (i32, i32, i32) {
    %c0_i32 = arith.constant 0 : i32
    %c0_i32_0 = arith.constant 0 : i32
    %c0_i32_1 = arith.constant 0 : i32
    return %arg0, %c0_i32, %c0_i32_0 : i32, i32, i32
  }
}

</mosaic_0001>

<bundles_post_ra>
// kernel: low_rank_mha.1
= control target key start
LH: loop header
LB: loop body
LE: loop exit
PB: predicated region body
PF: predicated region fallthrough
CT: control target
= control target key end

     0   :  { %8 = vsyncpa [#allocation3], 0  ;;  %s1669_s0 = inlined_call_operand.hbm [shape: f32[2,8,32], index: 0, kind: input, shape index: {}]   ;;  %s1670_s1 = inlined_call_operand.hbm [shape: bf16[32,128], index: 1, kind: input, shape index: {}]   ;;  %s1671_s2 = inlined_call_operand.hbm [shape: f32[48,128], index: 2, kind: input, shape index: {}]   ;;  %s1672_s3 = inlined_call_operand.hbm [shape: f32[2,8,32], index: 3, kind: output, shape index: {}]  }
   0x1   :  { %9 = vsyncpa [#allocation6], 0 }
   0x2   :  { %10 = vsyncpa [#allocation4], 0  ;;  %s1427_s12 = smov [#allocation5]  }
   0x3   :  { %s28_s13 = sshll.u32 %s1427_s12, 4  ;;  %s29_s13 = int_to_ptr.vmem [resolvable:$true] %s28_s13 }
   0x4   :  { %s1349_s14 = scalar_lea.vmem %s29_s13, 256  ;;  %p1354_p1 = scmp.lt.s32.totalorder %s29_s13, %s29_s13 }
   0x5   :  { %p1350_p0 = scmp.ne.s32.totalorder %s29_s13, %s1349_s14  ;;  %p1355_p2 = scmp.lt.s32.totalorder %s1349_s14, %s1349_s14 }
   0x7   :  { %p1356_p3 = por %p1355_p2, %p1354_p1 }
   0x9   :  { %p1357_p4 = pnand %p1356_p3, %p1350_p0 }
   0xb   :  { %1360 = shalt.err (!%p1357_p4)
}
   0xc   :  { %s1428_s15 = smov 64   ;;  %s1429_s16 = smov 4  }
   0xd   :  { %34 = dma.hbm_to_vmem [thread:$0]  %s1670_s1, 256, %s29_s13, [#allocation6], %s1428_s15, %s1428_s15, %s1429_s16  }
   0xe   :  { %s1430_s19 = smov [#allocation2]  }
   0xf   :  { %s16_s20 = sshll.u32 %s1430_s19, 4  ;;  %s17_s20 = int_to_ptr.vmem [resolvable:$true] %s16_s20 }
  0x10   :  { %s1369_s21 = scalar_lea.vmem %s17_s20, 256  ;;  %p1374_p6 = scmp.lt.s32.totalorder %s17_s20, %s17_s20 }
  0x11   :  { %p1370_p5 = scmp.ne.s32.totalorder %s17_s20, %s1369_s21  ;;  %p1375_p7 = scmp.lt.s32.totalorder %s1369_s21, %s1369_s21 }
  0x13   :  { %p1376_p8 = por %p1375_p7, %p1374_p6 }
  0x15   :  { %p1377_p9 = pnand %p1376_p8, %p1370_p5 }
  0x17   :  { %1380 = shalt.err (!%p1377_p9)
}
  0x18   :  { %s1431_s22 = smov 128   ;;  %s1432_s23 = smov 8  }
  0x19   :  { %22 = dma.hbm_to_vmem [thread:$0]  %s1669_s0, 256, %s17_s20, [#allocation3], %s1431_s22, %s1431_s22, %s1432_s23  }
  0x1a   :  { %s1433_s1 = smov [#allocation7]  }
  0x1b   :  { %s40_s26 = sshll.u32 %s1433_s1, 4  ;;  %s41_s26 = int_to_ptr.vmem [resolvable:$true] %s40_s26 }
  0x1c   :  { %s1389_s27 = scalar_lea.vmem %s41_s26, 768  ;;  %p1394_p11 = scmp.lt.s32.totalorder %s41_s26, %s41_s26 }
  0x1d   :  { %p1390_p10 = scmp.ne.s32.totalorder %s41_s26, %s1389_s27  ;;  %p1395_p12 = scmp.lt.s32.totalorder %s1389_s27, %s1389_s27 }
  0x1f   :  { %p1396_p13 = por %p1395_p12, %p1394_p11 }
  0x21   :  { %p1397_p0 = pnand %p1396_p13, %p1390_p10 }
  0x23   :  { %1400 = shalt.err (!%p1397_p0)
}
  0x24   :  { %46 = dma.hbm_to_vmem [thread:$0]  %s1671_s2, 768, %s41_s26, [#allocation6], %s1431_s22, %s1431_s22, %s1432_s23  }
  0x25   :  { %1421 = dma.done.wait [#allocation3], 256  }
  0x26   :  { %1422 = vsyncadd [#allocation3], 4294967040 }
  0x27   :  { %1423 = dma.done.wait [#allocation6], 1024  }
  0x28   :  { %1424 = vsyncadd [#allocation6], 4294966272  ;;  %v68_v0 = vld [vmem:[#allocation2] sm:$0xff]  ;;  %vm73_vm0 = vcmask 261120   ;;  %v70_v1 = vld [vmem:[#allocation2 + $0x8] sm:$0xff]  ;;  %v1434_v7 = vmov 0.0  }
  0x29   :  { %v71_v2 = vand.u32 2147483647, %v68_v0  ;;  %v72_v3 = vand.u32 2147483647, %v70_v1  ;;  %v1483_v6 = vld [vmem:[#allocation5 + $0x8] sm:$0xff]   ;;  %1154 = vmatprep.subr.bf16.mxu0 %v1434_v7  ;;  %vm1435_vm1 = vmmov 0  }
  0x2a   :  { %1158 = vmatprep.mubr.msk.bf16.mxu0 %vm1435_vm1, %v1434_v7  ;;  %1155 = vmatpush3.bf16.msra.mxu0 %v1483_v6  ;;  %v1489_v8 = vld [vmem:[#allocation5] sm:$0xff]   ;;  %v61_v9 = vld [vmem:[#allocation7] sm:$0xff]  ;;  %s1436_s0 = smov 96   ;;  %s1437_s2 = smov 32   ;;  %v1496_v40 = vld [vmem:[#allocation7 + $0x8] ss:$0 sm:$0xff] }
  0x2b   :  { %v74_v4 = vsel %vm73_vm0, %v71_v2, -inf  ;;  %v77_v5 = vsel %vm73_vm0, %v72_v3, -inf  ;;  %1156 = vmatprep.subr.bf16.mxu0 %v1434_v7  ;;  %183 = vrot.lane.b32.xlu1 %v61_v9, %s1436_s0  ;;  %v1074_v43 = vld [vmem:[#allocation7 + $0x9] ss:$0 sm:$0xff]  ;;  %v1506_v55 = vld [vmem:[#allocation7 + $0x10] sm:$0xff]  ;;  %v1520_v61 = vld [vmem:[#allocation7 + $0x20] sm:$0xff] }
  0x2c   :  { %75 = vmax.xlane.f32.xlu0 %v74_v4  ;;  %v1516_v60 = vld [vmem:[#allocation7 + $0x28] sm:$0xff]  ;;  %v1524_v62 = vld [vmem:[#allocation7 + $0x18] sm:$0xff]  ;;  %s1438_s30 = smov 120   ;;  %s1439_s4 = smov 116   ;;  %vm408_vm4 = vcmask 31744   ;;  %vm671_vm5 = vcmask 64512  }
  0x2d   :  { %s1440_s5 = smov 124   ;;  %s1441_s6 = smov 112   ;;  %vm673_vm6 = vcmask 130048   ;;  %vm675_vm7 = vcmask 195584  }
  0x2e   :  { %1157 = vmatpush3.bf16.msra.mxu0 %v1489_v8  ;;  %s1442_s7 = smov 104   ;;  %s1443_s8 = smov 16  }
  0x2f   :  { %168 = vrot.lane.b32.xlu1 %v61_v9, %s1437_s2  ;;  %s1444_s9 = smov 24   ;;  %s1445_s10 = smov [#allocation8]  }
  0x30   :  { %78 = vmax.xlane.f32.xlu0 %v77_v5  ;;  %s1057_s11 = sshll.u32 %s1445_s10, 4  ;;  %s1058_s11 = int_to_ptr.vmem [resolvable:$true] %s1057_s11 }
  0x31   :  { %s1401_s12 = scalar_lea.vmem %s1058_s11, 256  ;;  %p1406_p2 = scmp.lt.s32.totalorder %s1058_s11, %s1058_s11 }
  0x32   :  { %p1402_p1 = scmp.ne.s32.totalorder %s1058_s11, %s1401_s12  ;;  %p1407_p3 = scmp.lt.s32.totalorder %s1401_s12, %s1401_s12 }
  0x34   :  { %p1408_p4 = por %p1407_p3, %p1406_p2 }
  0x36   :  { %p1409_p5 = pnand %p1408_p4, %p1402_p1 }
  0x9d   :  { %v184_v50 = vpop.permute.xlu1 %183 }
  0xa1   :  { %v169_v57 = vpop.permute.xlu1 %168 }
  0xb5   :  { %v76_v10 = vpop.xlane.xlu0 %75 }
  0xb6   :  { %v80_v11 = vmax.f32 %v76_v10, 1e-06 }
  0xb8   :  { %1301 = vrcp.f32 %v80_v11  ;;  %v151_v39 = vmul.f32 0.14285715, %v80_v11 }
  0xb9   :  { %v79_v12 = vpop.xlane.xlu0 %78 }
  0xba   :  { %v81_v13 = vmax.f32 %v79_v12, 1e-06 }
  0xbc   :  { %1303 = vrcp.f32 %v81_v13  ;;  %v152_v46 = vmul.f32 0.14285715, %v81_v13 }
  0xc5   :  { %v1302_v14 = vpop.eup %1301 }
  0xc6   :  { %v83_v15 = vmul.f32 %v1302_v14, %v68_v0 }
  0xc8   :  { %v86_v16 = vmul.f32 7.0, %v83_v15 }
  0xc9   :  { %v1304_v17 = vpop.eup %1303 }
  0xca   :  { %v85_v18 = vmul.f32 %v1304_v17, %v70_v1  ;;  %v1250_v19 = vcvt.f32.s32 %v86_v16  ;;  %v1248_v22 = vand.u32 2147483647, %v86_v16  ;;  %v1253_v24 = vand.u32 2147483648, %v86_v16 }
  0xcc   :  { %v87_v20 = vmul.f32 7.0, %v85_v18  ;;  %v1251_v21 = vcvt.s32.f32 %v1250_v19  ;;  %vm1249_vm2 = vcmp.lt.f32.partialorder %v1248_v22, 8388608.0 }
  0xce   :  { %v1252_v23 = vand.u32 2147483647, %v1251_v21  ;;  %v1258_v25 = vcvt.f32.s32 %v87_v20  ;;  %v1256_v28 = vand.u32 2147483647, %v87_v20  ;;  %v1261_v31 = vand.u32 2147483648, %v87_v20 }
  0xd0   :  { %v1254_v26 = vor.u32 %v1253_v24, %v1252_v23  ;;  %v1259_v27 = vcvt.s32.f32 %v1258_v25  ;;  %vm1257_vm3 = vcmp.lt.f32.partialorder %v1256_v28, 8388608.0 }
  0xd2   :  { %v1255_v29 = vsel %vm1249_vm2, %v1254_v26, %v86_v16  ;;  %v1260_v30 = vand.u32 2147483647, %v1259_v27 }
  0xd3   :  { %v90_v33 = vmax.f32 %v1255_v29, -8.0 }
  0xd4   :  { %v1262_v32 = vor.u32 %v1261_v31, %v1260_v30 }
  0xd5   :  { %v92_v36 = vmin.f32 %v90_v33, 7.0 }
  0xd6   :  { %v1263_v34 = vsel %vm1257_vm3, %v1262_v32, %v87_v20 }
  0xd7   :  { %v91_v35 = vmax.f32 %v1263_v34, -8.0 }
  0xd9   :  { %v93_v37 = vmin.f32 %v91_v35, 7.0 }
  0xdb   :  { %v94_v38 = vpack.c.bf16 %v93_v37, %v92_v36 }
  0xdd   :  { %1159 = vmatmul.mubr.msk.bf16.vlgmr.msra.gmra.mxu0 %vm73_vm0, %v94_v38 }
 0x19d   :  { %v144_v41 = vpop.f32.mrf.mxu0 }
 0x19e   :  { %v153_v42 = vmul.f32 %v151_v39, %v144_v41 }
 0x19f   :  { %v1160_v44 = vpop.f32.mrf.mxu0 }
 0x1a0   :  { %v159_v45 = vmul.f32 %v1496_v40, %v153_v42 }
 0x1a1   :  { %v147_v47 = vpop.f32.mrf.mxu0 }
 0x1a2   :  { %v1499_v48 = vadd.f32 %v1074_v43, %v159_v45  ;;  %v154_v49 = vmul.f32 %v152_v46, %v147_v47 }
 0x1a3   :  { %v1161_v51 = vpop.f32.mrf.mxu0 }
 0x1a4   :  { %v186_v52 = vmul.f32 %v184_v50, %v1499_v48  ;;  %v160_v53 = vmul.f32 %v1496_v40, %v154_v49  ;;  %v171_v58 = vmul.f32 %v169_v57, %v1499_v48 }
 0x1a6   :  { %v1503_v54 = vadd.f32 %v1074_v43, %v160_v53  ;;  %190 = vrot.lane.b32.xlu0 %v186_v52, %s1436_s0 }
 0x1a8   :  { %v187_v56 = vmul.f32 %v184_v50, %v1503_v54  ;;  %v172_v59 = vmul.f32 %v169_v57, %v1503_v54 }
 0x1aa   :  { %192 = vrot.lane.b32.xlu1 %v187_v56, %s1436_s0  ;;  %208 = vrot.lane.b32.xlu0 %v1506_v55, %s1436_s0 }
 0x1ae   :  { %175 = vrot.lane.b32.xlu1 %v171_v58, %s1436_s0 }
 0x1b2   :  { %177 = vrot.lane.b32.xlu1 %v172_v59, %s1436_s0 }
 0x1b6   :  { %214 = vrot.lane.b32.xlu1 %v1516_v60, %s1436_s0 }
 0x1ba   :  { %212 = vrot.lane.b32.xlu1 %v1520_v61, %s1436_s0 }
 0x1be   :  { %210 = vrot.lane.b32.xlu1 %v1524_v62, %s1436_s0 }
 0x218   :  { %v191_v63 = vpop.permute.xlu0 %190 }
 0x219   :  { %v196_v0 = vadd.f32 %v191_v63, %v186_v52 }
 0x21b   :  { %301 = vrot.lane.b32.xlu1 %v196_v0, %s1436_s0 }
 0x21c   :  { %v193_v1 = vpop.permute.xlu1 %192  ;;  %v209_v13 = vpop.permute.xlu0 %208 }
 0x21d   :  { %v197_v2 = vadd.f32 %v193_v1, %v187_v56 }
 0x21f   :  { %303 = vrot.lane.b32.xlu0 %v197_v2, %s1436_s0 }
 0x220   :  { %v176_v3 = vpop.permute.xlu1 %175 }
 0x221   :  { %v181_v4 = vadd.f32 %v176_v3, %v171_v58 }
 0x223   :  { %200 = vrot.lane.b32.xlu1 %v181_v4, %s1436_s0 }
 0x224   :  { %v178_v5 = vpop.permute.xlu1 %177 }
 0x225   :  { %v182_v9 = vadd.f32 %v178_v5, %v172_v59 }
 0x227   :  { %202 = vrot.lane.b32.xlu0 %v182_v9, %s1436_s0 }
 0x228   :  { %v215_v10 = vpop.permute.xlu1 %214 }
 0x229   :  { %1162 = vmatprep.subr.mxu1 %v215_v10  ;;  %1173 = vmatprep.subr.mxu0 %v215_v10 }
 0x22a   :  { %1163 = vmatpush3.msra.mxu1 %v215_v10  ;;  %1174 = vmatpush3.msra.mxu0 %v215_v10 }
 0x22c   :  { %v213_v11 = vpop.permute.xlu1 %212 }
 0x22d   :  { %1164 = vmatprep.subr.mxu1 %v213_v11  ;;  %1175 = vmatprep.subr.mxu0 %v213_v11 }
 0x22e   :  { %1165 = vmatpush3.msra.mxu1 %v213_v11  ;;  %1176 = vmatpush3.msra.mxu0 %v213_v11 }
 0x230   :  { %v211_v12 = vpop.permute.xlu1 %210 }
 0x231   :  { %1166 = vmatprep.subr.mxu1 %v211_v12  ;;  %1177 = vmatprep.subr.mxu0 %v211_v12 }
 0x232   :  { %1167 = vmatpush3.msra.mxu1 %v211_v12  ;;  %1178 = vmatpush3.msra.mxu0 %v211_v12 }
 0x233   :  { %1168 = vmatprep.subr.mxu1 %v209_v13  ;;  %1179 = vmatprep.subr.mxu0 %v209_v13 }
 0x234   :  { %1169 = vmatpush3.msra.mxu1 %v209_v13  ;;  %1180 = vmatpush3.msra.mxu0 %v209_v13 }
 0x28d   :  { %v302_v14 = vpop.permute.xlu1 %301 }
 0x28e   :  { %1181 = vmatprep.mubr.msk.f32.mxu0 %vm73_vm0, %v302_v14 }
 0x291   :  { %v304_v15 = vpop.permute.xlu0 %303 }
 0x292   :  { %1182 = vmatmul.mubr.msk.f32.vlgmr.msra.gmra.mxu0 %vm73_vm0, %v304_v15 }
 0x295   :  { %v201_v16 = vpop.permute.xlu1 %200 }
 0x296   :  { %1170 = vmatprep.mubr.msk.f32.mxu1 %vm73_vm0, %v201_v16 }
 0x299   :  { %v203_v17 = vpop.permute.xlu0 %202 }
 0x29a   :  { %1171 = vmatmul.mubr.msk.f32.vlgmr.msra.gmra.mxu1 %vm73_vm0, %v203_v17 }
 0x352   :  { %v1536_v18 = vpop.f32.mrf.mxu0 }
 0x354   :  { %v375_v19 = vpop.f32.mrf.mxu0 }
 0x355   :  { %394 = vrot.lane.b32.xlu0 %v375_v19, %s1438_s30  ;;  %396 = vrot.lane.b32.xlu1 %v375_v19, %s1439_s4 }
 0x359   :  { %392 = vrot.lane.b32.xlu1 %v375_v19, %s1440_s5 }
 0x35a   :  { %v1541_v20 = vpop.f32.mrf.mxu1 }
 0x35c   :  { %v290_v21 = vpop.f32.mrf.mxu1 }
 0x35d   :  { %1192 = vmatprep.mubr.msk.f32.mxu1 %vm408_vm4, %v290_v21  ;;  %385 = vrot.lane.b32.xlu0 %v290_v21, %s1440_s5 }
 0x35e   :  { %387 = vrot.lane.b32.xlu1 %v290_v21, %s1438_s30 }
 0x361   :  { %389 = vrot.lane.b32.xlu0 %v290_v21, %s1439_s4 }
 0x3c7   :  { %v397_v22 = vpop.permute.xlu1 %396  ;;  %v395_v23 = vpop.permute.xlu0 %394 }
 0x3c8   :  { %1184 = vmatprep.subr.msk.mxu1 %vm408_vm4, %v397_v22 }
 0x3c9   :  { %1185 = vmatpush3.xpose.msk.msra.mxu1 %vm408_vm4, %v397_v22 }
 0x3ca   :  { %1186 = vmatprep.subr.msk.mxu1 %vm408_vm4, %v395_v23 }
 0x3cb   :  { %v393_v24 = vpop.permute.xlu1 %392 }
 0x3cd   :  { %1187 = vmatpush3.xpose.msk.msra.mxu1 %vm408_vm4, %v395_v23 }
 0x3ce   :  { %1188 = vmatprep.subr.msk.mxu1 %vm408_vm4, %v393_v24 }
 0x3cf   :  { %v386_v25 = vpop.permute.xlu0 %385 }
 0x3d0   :  { %v388_v26 = vpop.permute.xlu1 %387 }
 0x3d1   :  { %1189 = vmatpush3.xpose.msk.msra.mxu1 %vm408_vm4, %v393_v24 }
 0x3d2   :  { %1190 = vmatprep.subr.msk.mxu1 %vm408_vm4, %v375_v19 }
 0x3d3   :  { %v390_v27 = vpop.permute.xlu0 %389 }
 0x3d5   :  { %1191 = vmatpush3.xpose.msk.msra.mxu1 %vm408_vm4, %v375_v19 }
 0x3d8   :  { %1193 = vmatmul.mubr.msk.f32.vlgmr.msra.gmra.mxu1 %vm408_vm4, %v386_v25 }
 0x3d9   :  { %1195 = vmatprep.mubr.msk.f32.mxu1 %vm408_vm4, %v388_v26 }
 0x3dc   :  { %1196 = vmatmul.mubr.msk.f32.gmra.mxu1 %vm408_vm4, %v390_v27 }
 0x498   :  { %v1194_v28 = vpop.f32.mrf.mxu1 }
 0x499   :  { %v511_v29 = vmul.f32 0.35355338, %v1194_v28 }
 0x49a   :  { %v491_v30 = vpop.f32.mrf.mxu1 }
 0x49b   :  { %v510_v31 = vmul.f32 0.35355338, %v491_v30  ;;  %v515_v32 = vadd.f32 %v511_v29, %v1524_v62 }
 0x49c   :  { %v1197_v33 = vpop.f32.mrf.mxu1 }
 0x49d   :  { %v513_v34 = vmul.f32 0.35355338, %v1197_v33  ;;  %v521_v35 = vsel %vm73_vm0, %v515_v32, -inf  ;;  %v514_v36 = vadd.f32 %v510_v31, %v1506_v55 }
 0x49e   :  { %522 = vmax.xlane.f32.xlu0 %v521_v35  ;;  %v501_v37 = vpop.f32.mrf.mxu1 }
 0x49f   :  { %v512_v38 = vmul.f32 0.35355338, %v501_v37  ;;  %v518_v39 = vsel %vm73_vm0, %v514_v36, -inf  ;;  %v517_v41 = vadd.f32 %v513_v34, %v1516_v60 }
 0x4a0   :  { %519 = vmax.xlane.f32.xlu1 %v518_v39 }
 0x4a1   :  { %v516_v42 = vadd.f32 %v512_v38, %v1520_v61  ;;  %v527_v43 = vsel %vm73_vm0, %v517_v41, -inf }
 0x4a3   :  { %v524_v44 = vsel %vm73_vm0, %v516_v42, -inf }
 0x4a4   :  { %528 = vmax.xlane.f32.xlu1 %v527_v43  ;;  %525 = vmax.xlane.f32.xlu0 %v524_v44 }
 0x4b5   :  { %402 = vrot.lane.b32.xlu1 %v1499_v48, %s1441_s6 }
 0x4b9   :  { %399 = vrot.lane.b32.xlu1 %v1499_v48, %s1438_s30 }
 0x4ba   :  { %405 = vrot.lane.b32.xlu0 %v1499_v48, %s1442_s7 }
 0x527   :  { %v523_v45 = vpop.xlane.xlu0 %522 }
 0x528   :  { %v531_v46 = vsub.f32 %v515_v32, %v523_v45 }
 0x529   :  { %v520_v47 = vpop.xlane.xlu1 %519 }
 0x52a   :  { %v536_v49 = vmul.f32 1.442695, %v531_v46  ;;  %v530_v50 = vsub.f32 %v514_v36, %v520_v47 }
 0x52c   :  { %1305 = vpow2.f32 %v536_v49  ;;  %v534_v51 = vmul.f32 1.442695, %v530_v50 }
 0x52d   :  { %v526_v52 = vpop.xlane.xlu0 %525  ;;  %v529_v53 = vpop.xlane.xlu1 %528 }
 0x52e   :  { %1307 = vpow2.f32 %v534_v51  ;;  %v533_v2 = vsub.f32 %v517_v41, %v529_v53  ;;  %v532_v3 = vsub.f32 %v516_v42, %v526_v52 }
 0x530   :  { %v540_v4 = vmul.f32 1.442695, %v533_v2  ;;  %v538_v5 = vmul.f32 1.442695, %v532_v3 }
 0x531   :  { %v406_v56 = vpop.permute.xlu0 %405  ;;  %v403_v57 = vpop.permute.xlu1 %402 }
 0x532   :  { %1198 = vmatprep.subr.mxu0 %v406_v56  ;;  %1309 = vpow2.f32 %v540_v4 }
 0x533   :  { %1199 = vmatpush3.msra.mxu0 %v406_v56  ;;  %1311 = vpow2.f32 %v538_v5 }
 0x534   :  { %1200 = vmatprep.subr.mxu0 %v403_v57 }
 0x535   :  { %1201 = vmatpush3.msra.mxu0 %v403_v57  ;;  %v400_v58 = vpop.permute.xlu1 %399 }
 0x536   :  { %1202 = vmatprep.subr.mxu0 %v400_v58 }
 0x537   :  { %1203 = vmatpush3.msra.mxu0 %v400_v58 }
 0x538   :  { %1204 = vmatprep.subr.mxu0 %v1499_v48 }
 0x539   :  { %v1306_v59 = vpop.eup %1305  ;;  %1205 = vmatpush3.msra.mxu0 %v1499_v48 }
 0x53a   :  { %v545_v63 = vsel %vm73_vm0, %v1306_v59, 0.0 }
 0x53b   :  { %v1308_v0 = vpop.eup %1307  ;;  %546 = vadd.xlane.f32.xlu1 %v545_v63 }
 0x53c   :  { %v542_v1 = vsel %vm73_vm0, %v1308_v0, 0.0 }
 0x53d   :  { %543 = vadd.xlane.f32.xlu0 %v542_v1 }
 0x53f   :  { %v1310_v48 = vpop.eup %1309 }
 0x540   :  { %v1312_v9 = vpop.eup %1311  ;;  %v551_v10 = vsel %vm73_vm0, %v1310_v48, 0.0 }
 0x541   :  { %v548_v11 = vsel %vm73_vm0, %v1312_v9, 0.0 }
 0x54c   :  { %687 = vrot.lane.b32.xlu1 %v1536_v18, %s1438_s30 }
 0x553   :  { %689 = vrot.lane.b32.xlu0 %v1536_v18, %s1439_s4 }
 0x570   :  { %552 = vadd.xlane.f32.xlu1 %v551_v10 }
 0x572   :  { %549 = vadd.xlane.f32.xlu0 %v548_v11 }
 0x581   :  { %678 = vrot.lane.b32.xlu1 %v1541_v20, %s1440_s5 }
 0x585   :  { %682 = vrot.lane.b32.xlu1 %v1541_v20, %s1439_s4 }
 0x588   :  { %685 = vrot.lane.b32.xlu0 %v1536_v18, %s1440_s5 }
 0x58c   :  { %680 = vrot.lane.b32.xlu0 %v1541_v20, %s1438_s30 }
 0x5c4   :  { %v547_v12 = vpop.xlane.xlu1 %546 }
 0x5c5   :  { %1313 = vrcp.f32 %v547_v12 }
 0x5c6   :  { %v544_v13 = vpop.xlane.xlu0 %543 }
 0x5c7   :  { %1315 = vrcp.f32 %v544_v13 }
 0x5c8   :  { %v688_v21 = vpop.permute.xlu1 %687 }
 0x5ca   :  { %v690_v14 = vpop.permute.xlu0 %689 }
 0x5cb   :  { %1212 = vmatprep.subr.msk.mxu0 %vm408_vm4, %v690_v14 }
 0x5d2   :  { %v1314_v15 = vpop.eup %1313 }
 0x5d3   :  { %v557_v19 = vmul.f32 %v1314_v15, %v1306_v59 }
 0x5d4   :  { %v1316_v16 = vpop.eup %1315 }
 0x5d5   :  { %v555_v17 = vmul.f32 %v1316_v16, %v1308_v0 }
 0x5d7   :  { %1206 = vmatprep.mubr.msk.f32.mxu0 %vm73_vm0, %v555_v17 }
 0x5d8   :  { %1207 = vmatmul.mubr.msk.f32.vlgmr.msra.gmra.mxu0 %vm73_vm0, %v557_v19 }
 0x5d9   :  { %1213 = vmatpush3.xpose.msk.msra.mxu0 %vm408_vm4, %v690_v14 }
 0x5da   :  { %1214 = vmatprep.subr.msk.mxu0 %vm408_vm4, %v688_v21 }
 0x5dd   :  { %1215 = vmatpush3.xpose.msk.msra.mxu0 %vm408_vm4, %v688_v21 }
 0x5f9   :  { %v553_v22 = vpop.xlane.xlu1 %552 }
 0x5fa   :  { %1317 = vrcp.f32 %v553_v22 }
 0x5fb   :  { %v550_v23 = vpop.xlane.xlu0 %549 }
 0x5fc   :  { %1319 = vrcp.f32 %v550_v23 }
 0x5fd   :  { %v679_v29 = vpop.permute.xlu1 %678 }
 0x5ff   :  { %v686_v24 = vpop.permute.xlu0 %685 }
 0x600   :  { %1216 = vmatprep.subr.msk.mxu0 %vm408_vm4, %v686_v24 }
 0x601   :  { %1217 = vmatpush3.xpose.msk.msra.mxu0 %vm408_vm4, %v686_v24  ;;  %v683_v31 = vpop.permute.xlu1 %682 }
 0x602   :  { %1218 = vmatprep.subr.msk.mxu0 %vm408_vm4, %v1536_v18 }
 0x603   :  { %v681_v30 = vpop.permute.xlu0 %680 }
 0x605   :  { %1219 = vmatpush3.xpose.msk.msra.mxu0 %vm408_vm4, %v1536_v18 }
 0x607   :  { %v1318_v25 = vpop.eup %1317 }
 0x608   :  { %v561_v28 = vmul.f32 %v1318_v25, %v1310_v48 }
 0x609   :  { %v1320_v26 = vpop.eup %1319 }
 0x60a   :  { %v559_v27 = vmul.f32 %v1320_v26, %v1312_v9 }
 0x60c   :  { %1209 = vmatprep.mubr.msk.f32.mxu0 %vm73_vm0, %v559_v27 }
 0x60d   :  { %1210 = vmatmul.mubr.msk.f32.gmra.mxu0 %vm73_vm0, %v561_v28 }
 0x60e   :  { %1220 = vmatprep.mubr.msk.f32.mxu0 %vm408_vm4, %v1541_v20 }
 0x611   :  { %1221 = vmatmul.mubr.msk.f32.vlgmr.msra.gmra.mxu0 %vm408_vm4, %v679_v29 }
 0x612   :  { %1223 = vmatprep.mubr.msk.f32.mxu0 %vm408_vm4, %v681_v30 }
 0x615   :  { %1224 = vmatmul.mubr.msk.f32.gmra.mxu0 %vm408_vm4, %v683_v31 }
 0x698   :  { %v1208_v18 = vpop.f32.mrf.mxu0 }
 0x69a   :  { %v1609_v32 = vpop.f32.mrf.mxu0 }
 0x6cd   :  { %v1211_v33 = vpop.f32.mrf.mxu0 }
 0x6cf   :  { %v650_v34 = vpop.f32.mrf.mxu0 }
 0x6d1   :  { %v1222_v35 = vpop.f32.mrf.mxu0 }
 0x6d2   :  { %v803_v36 = vmul.f32 0.35355338, %v1222_v35 }
 0x6d3   :  { %v783_v37 = vpop.f32.mrf.mxu0 }
 0x6d4   :  { %v802_v38 = vmul.f32 0.35355338, %v783_v37  ;;  %v807_v39 = vadd.f32 %v803_v36, %v1524_v62 }
 0x6d5   :  { %v1225_v20 = vpop.f32.mrf.mxu0 }
 0x6d6   :  { %v813_v41 = vsel %vm73_vm0, %v807_v39, -inf  ;;  %v806_v42 = vadd.f32 %v802_v38, %v1506_v55  ;;  %v805_v44 = vmul.f32 0.35355338, %v1225_v20 }
 0x6d7   :  { %814 = vmax.xlane.f32.xlu1 %v813_v41  ;;  %v793_v43 = vpop.f32.mrf.mxu0 }
 0x6d8   :  { %v804_v45 = vmul.f32 0.35355338, %v793_v43  ;;  %v810_v46 = vsel %vm73_vm0, %v806_v42, -inf  ;;  %v809_v50 = vadd.f32 %v805_v44, %v1516_v60 }
 0x6d9   :  { %811 = vmax.xlane.f32.xlu0 %v810_v46 }
 0x6da   :  { %v808_v47 = vadd.f32 %v804_v45, %v1520_v61  ;;  %v819_v62 = vsel %vm73_vm0, %v809_v50, -inf }
 0x6dc   :  { %v816_v49 = vsel %vm73_vm0, %v808_v47, -inf }
 0x6dd   :  { %817 = vmax.xlane.f32.xlu0 %v816_v49 }
 0x6e1   :  { %820 = vmax.xlane.f32.xlu0 %v819_v62 }
 0x6e8   :  { %698 = vrot.lane.b32.xlu1 %v1503_v54, %s1442_s7 }
 0x760   :  { %v815_v55 = vpop.xlane.xlu1 %814 }
 0x761   :  { %v823_v51 = vsub.f32 %v807_v39, %v815_v55 }
 0x762   :  { %v812_v52 = vpop.xlane.xlu0 %811 }
 0x763   :  { %v828_v53 = vmul.f32 1.442695, %v823_v51  ;;  %v822_v56 = vsub.f32 %v806_v42, %v812_v52 }
 0x764   :  { %v699_v57 = vpop.permute.xlu1 %698 }
 0x765   :  { %1321 = vpow2.f32 %v828_v53  ;;  %v826_v58 = vmul.f32 1.442695, %v822_v56  ;;  %1226 = vmatprep.subr.mxu1 %v699_v57 }
 0x766   :  { %v818_v61 = vpop.xlane.xlu0 %817  ;;  %1227 = vmatpush3.msra.mxu1 %v699_v57 }
 0x767   :  { %1323 = vpow2.f32 %v826_v58  ;;  %v824_v60 = vsub.f32 %v808_v47, %v818_v61 }
 0x769   :  { %v830_v59 = vmul.f32 1.442695, %v824_v60 }
 0x76a   :  { %v821_v63 = vpop.xlane.xlu0 %820 }
 0x76b   :  { %1325 = vpow2.f32 %v830_v59  ;;  %v825_v0 = vsub.f32 %v809_v50, %v821_v63 }
 0x76d   :  { %v832_v1 = vmul.f32 1.442695, %v825_v0 }
 0x76f   :  { %1327 = vpow2.f32 %v832_v1 }
 0x772   :  { %v1322_v2 = vpop.eup %1321 }
 0x773   :  { %v837_v3 = vsel %vm73_vm0, %v1322_v2, 0.0 }
 0x774   :  { %v1324_v4 = vpop.eup %1323  ;;  %838 = vadd.xlane.f32.xlu0 %v837_v3 }
 0x775   :  { %v834_v5 = vsel %vm73_vm0, %v1324_v4, 0.0 }
 0x776   :  { %835 = vadd.xlane.f32.xlu1 %v834_v5 }
 0x778   :  { %v1326_v48 = vpop.eup %1325 }
 0x779   :  { %v840_v9 = vsel %vm73_vm0, %v1326_v48, 0.0 }
 0x77a   :  { %841 = vadd.xlane.f32.xlu1 %v840_v9 }
 0x77c   :  { %v1328_v10 = vpop.eup %1327 }
 0x77d   :  { %v843_v11 = vsel %vm73_vm0, %v1328_v10, 0.0 }
 0x77e   :  { %844 = vadd.xlane.f32.xlu0 %v843_v11 }
 0x78b   :  { %692 = vrot.lane.b32.xlu1 %v1503_v54, %s1438_s30 }
 0x78f   :  { %660 = vrot.lane.b32.xlu1 %v1208_v18, %s1432_s23 }
 0x793   :  { %664 = vrot.lane.b32.xlu1 %v650_v34, %s1443_s8 }
 0x794   :  { %695 = vrot.lane.b32.xlu0 %v1503_v54, %s1441_s6 }
 0x797   :  { %668 = vrot.lane.b32.xlu1 %v1211_v33, %s1444_s9 }
 0x7fd   :  { %v839_v12 = vpop.xlane.xlu0 %838 }
 0x7fe   :  { %1329 = vrcp.f32 %v839_v12 }
 0x7ff   :  { %v836_v13 = vpop.xlane.xlu1 %835 }
 0x800   :  { %1331 = vrcp.f32 %v836_v13 }
 0x803   :  { %v842_v14 = vpop.xlane.xlu1 %841 }
 0x804   :  { %1333 = vrcp.f32 %v842_v14 }
 0x807   :  { %v845_v15 = vpop.xlane.xlu0 %844  ;;  %v693_v16 = vpop.permute.xlu1 %692 }
 0x808   :  { %1335 = vrcp.f32 %v845_v15 }
 0x80b   :  { %v696_v17 = vpop.permute.xlu0 %695  ;;  %v661_v19 = vpop.permute.xlu1 %660 }
 0x80c   :  { %v1330_v21 = vpop.eup %1329  ;;  %1228 = vmatprep.subr.mxu1 %v696_v17  ;;  %v672_v27 = vsel %vm671_vm5, %v1609_v32, %v661_v19 }
 0x80d   :  { %v1332_v22 = vpop.eup %1331  ;;  %1229 = vmatpush3.msra.mxu1 %v696_v17  ;;  %v849_v25 = vmul.f32 %v1330_v21, %v1322_v2 }
 0x80e   :  { %1230 = vmatprep.subr.mxu1 %v693_v16  ;;  %v847_v23 = vmul.f32 %v1332_v22, %v1324_v4 }
 0x80f   :  { %1231 = vmatpush3.msra.mxu1 %v693_v16  ;;  %v665_v24 = vpop.permute.xlu1 %664 }
 0x810   :  { %1232 = vmatprep.subr.mxu1 %v1503_v54  ;;  %1234 = vmatprep.mubr.msk.f32.mxu1 %vm73_vm0, %v847_v23  ;;  %v674_v29 = vsel %vm673_vm6, %v672_v27, %v665_v24 }
 0x811   :  { %v1334_v26 = vpop.eup %1333  ;;  %1233 = vmatpush3.msra.mxu1 %v1503_v54 }
 0x812   :  { %1235 = vmatmul.mubr.msk.f32.vlgmr.msra.gmra.mxu1 %vm73_vm0, %v849_v25  ;;  %v851_v28 = vmul.f32 %v1334_v26, %v1326_v48  ;;  %1240 = vmatprep.subr.bf16.mxu1 %v1434_v7 }
 0x813   :  { %v669_v30 = vpop.permute.xlu1 %668 }
 0x814   :  { %v676_v31 = vsel %vm675_vm7, %v674_v29, %v669_v30  ;;  %1237 = vmatprep.mubr.msk.f32.mxu1 %vm73_vm0, %v851_v28 }
 0x815   :  { %v1336_v18 = vpop.eup %1335  ;;  %v966_v33 = vand.u32 2147483647, %v676_v31 }
 0x816   :  { %v853_v34 = vmul.f32 %v1336_v18, %v1328_v10 }
 0x817   :  { %v968_v54 = vsel %vm73_vm0, %v966_v33, -inf }
 0x818   :  { %1238 = vmatmul.mubr.msk.f32.gmra.mxu1 %vm73_vm0, %v853_v34  ;;  %969 = vmax.xlane.f32.xlu1 %v968_v54 }
 0x819   :  { %1244 = vmatprep.mubr.msk.bf16.mxu1 %vm1435_vm1, %v1434_v7 }
 0x829   :  { %989 = vrot.lane.b32.xlu1 %v1489_v8, %s1437_s2 }
 0x82d   :  { %1044 = vrot.lane.b32.xlu1 %v1496_v40, %s1437_s2 }
 0x8a1   :  { %v970_v44 = vpop.xlane.xlu1 %969 }
 0x8a2   :  { %v974_v45 = vmax.f32 %v970_v44, 1e-06 }
 0x8a4   :  { %1337 = vrcp.f32 %v974_v45  ;;  %v1039_v13 = vmul.f32 0.14285715, %v974_v45 }
 0x8a5   :  { %v990_v51 = vpop.permute.xlu1 %989 }
 0x8a9   :  { %v1045_v15 = vpop.permute.xlu1 %1044 }
 0x8b1   :  { %v1338_v46 = vpop.eup %1337 }
 0x8b2   :  { %v977_v49 = vmul.f32 %v1338_v46, %v676_v31 }
 0x8b4   :  { %v980_v55 = vmul.f32 7.0, %v977_v49 }
 0x8b6   :  { %v1266_v52 = vcvt.f32.s32 %v980_v55  ;;  %v1269_v58 = vand.u32 2147483648, %v980_v55  ;;  %v1264_v60 = vand.u32 2147483647, %v980_v55 }
 0x8b8   :  { %v1267_v53 = vcvt.s32.f32 %v1266_v52  ;;  %vm1265_vm8 = vcmp.lt.f32.partialorder %v1264_v60, 8388608.0 }
 0x8ba   :  { %v1268_v57 = vand.u32 2147483647, %v1267_v53 }
 0x8bc   :  { %v1270_v63 = vor.u32 %v1269_v58, %v1268_v57 }
 0x8be   :  { %v1271_v4 = vsel %vm1265_vm8, %v1270_v63, %v980_v55 }
 0x8d2   :  { %v1236_v32 = vpop.f32.mrf.mxu1 }
 0x8d3   :  { %952 = vrot.lane.b32.xlu0 %v1236_v32, %s1432_s23 }
 0x8d4   :  { %v932_v35 = vpop.f32.mrf.mxu1 }
 0x8d8   :  { %v1239_v36 = vpop.f32.mrf.mxu1 }
 0x8da   :  { %v942_v37 = vpop.f32.mrf.mxu1 }
 0x8db   :  { %956 = vrot.lane.b32.xlu0 %v942_v37, %s1443_s8 }
 0x8df   :  { %960 = vrot.lane.b32.xlu0 %v1239_v36, %s1444_s9 }
 0x945   :  { %v953_v38 = vpop.permute.xlu0 %952 }
 0x946   :  { %v963_v20 = vsel %vm671_vm5, %v932_v35, %v953_v38 }
 0x94d   :  { %v957_v39 = vpop.permute.xlu0 %956 }
 0x94e   :  { %v964_v41 = vsel %vm673_vm6, %v963_v20, %v957_v39 }
 0x951   :  { %v961_v8 = vpop.permute.xlu0 %960 }
 0x952   :  { %v965_v42 = vsel %vm675_vm7, %v964_v41, %v961_v8 }
 0x953   :  { %v967_v40 = vand.u32 2147483647, %v965_v42 }
 0x955   :  { %v971_v43 = vsel %vm73_vm0, %v967_v40, -inf }
 0x956   :  { %972 = vmax.xlane.f32.xlu0 %v971_v43 }
 0x96c   :  { %991 = vrot.lane.b32.xlu0 %v1483_v6, %s1437_s2 }
 0x9df   :  { %v973_v47 = vpop.xlane.xlu0 %972 }
 0x9e0   :  { %v975_v50 = vmax.f32 %v973_v47, 1e-06 }
 0x9e2   :  { %1339 = vrcp.f32 %v975_v50  ;;  %v1040_v21 = vmul.f32 0.14285715, %v975_v50 }
 0x9e3   :  { %v992_v62 = vpop.permute.xlu0 %991 }
 0x9e4   :  { %1241 = vmatpush3.bf16.msra.mxu1 %v992_v62 }
 0x9e5   :  { %1242 = vmatprep.subr.bf16.mxu1 %v1434_v7  ;;  %v984_v7 = vmax.f32 %v1271_v4, -8.0 }
 0x9e7   :  { %v986_v10 = vmin.f32 %v984_v7, 7.0 }
 0x9e8   :  { %1243 = vmatpush3.bf16.msra.mxu1 %v990_v51 }
 0x9ef   :  { %v1340_v56 = vpop.eup %1339 }
 0x9f0   :  { %v979_v6 = vmul.f32 %v1340_v56, %v965_v42 }
 0x9f2   :  { %v981_v61 = vmul.f32 7.0, %v979_v6 }
 0x9f4   :  { %v1274_v59 = vcvt.f32.s32 %v981_v61  ;;  %v1272_v1 = vand.u32 2147483647, %v981_v61  ;;  %v1277_v3 = vand.u32 2147483648, %v981_v61 }
 0x9f6   :  { %v1275_v0 = vcvt.s32.f32 %v1274_v59  ;;  %vm1273_vm9 = vcmp.lt.f32.partialorder %v1272_v1, 8388608.0 }
 0x9f8   :  { %v1276_v2 = vand.u32 2147483647, %v1275_v0 }
 0x9fa   :  { %v1278_v5 = vor.u32 %v1277_v3, %v1276_v2 }
 0x9fc   :  { %v1279_v48 = vsel %vm1273_vm9, %v1278_v5, %v981_v61 }
 0x9fd   :  { %v985_v9 = vmax.f32 %v1279_v48, -8.0 }
 0x9ff   :  { %v987_v11 = vmin.f32 %v985_v9, 7.0 }
 0xa01   :  { %v988_v12 = vpack.c.bf16 %v987_v11, %v986_v10 }
 0xa03   :  { %1245 = vmatmul.mubr.msk.bf16.vlgmr.msra.gmra.mxu1 %vm73_vm0, %v988_v12 }
 0xac3   :  { %v1032_v14 = vpop.f32.mrf.mxu1 }
 0xac4   :  { %v1041_v16 = vmul.f32 %v1039_v13, %v1032_v14 }
 0xac5   :  { %v1246_v17 = vpop.f32.mrf.mxu1 }
 0xac6   :  { %v1047_v19 = vmul.f32 %v1045_v15, %v1041_v16 }
 0xac7   :  { %v1035_v22 = vpop.f32.mrf.mxu1 }
 0xac8   :  { %1049 = vst.msk [vmem:[#allocation8] sm:$0xff] %vm73_vm0, %v1047_v19  ;;  %v1042_v23 = vmul.f32 %v1040_v21, %v1035_v22 }
 0xac9   :  { %v1247_v24 = vpop.f32.mrf.mxu1 }
 0xaca   :  { %v1048_v25 = vmul.f32 %v1045_v15, %v1042_v23 }
 0xacc   :  { %1051 = vst.msk [vmem:[#allocation8 + $0x8] sm:$0xff] %vm73_vm0, %v1048_v25 }
 0xacd   :  { %1412 = shalt.err (!%p1409_p5)
}
 0xace   :  { %1063 = dma.vmem_to_hbm [thread:$0]  %s1058_s11, 256, %s1672_s3, [#allocation4], %s1431_s22, %s1431_s22, %s1432_s23  }
 0xacf   :  { %1425 = dma.done.wait [#allocation4], 256  }
 0xad0   :  { %1426 = vsyncadd [#allocation4], 4294967040 }
 0xad1   :  { %1067 = vsyncpa [#allocation3], 1 }
 0xad2   :  { %1068 = vsyncpa [#allocation6], 1 }
 0xad3   :  { %1069 = vsyncpa [#allocation4], 1 }

</bundles_post_ra>
